<compile_context>
chip_gen: v6e
topology: v6e:2x2x1
jax: 0.10.0
libtpu: 0.0.40
codegen_flags: <defaults>
</compile_context>

<pallas_src>
import math
from functools import partial

import jax
import jax.numpy as jnp
import numpy as np
from jax.experimental import pallas as pl
from jax.experimental.pallas import tpu as pltpu

_EPS = 1e-12
_INV_SQRT2 = 1.0 / math.sqrt(2.0)


def _intermediate_kernel(x_ref, w1_ref, b1_ref, w2_ref, b2_ref, lnw_ref, lnb_ref,
                         o_ref, acc_ref, *, true_h, padded_h):
    k = pl.program_id(1)

    @pl.when(k == 0)
    def _():
        acc_ref[...] = jnp.zeros_like(acc_ref)

    x = x_ref[...]                                             # (bm, Hp) f32

    # dense_1 chunk (Hp -> tff) + erf-GELU; bf16 MXU operands, f32 accumulate.
    z = jnp.dot(x.astype(jnp.bfloat16), w1_ref[...],
                preferred_element_type=jnp.float32) + b1_ref[...]
    z = z * 0.5 * (1.0 + jax.lax.erf(z * _INV_SQRT2))

    # dense_2 partial (tff -> Hp), accumulated in the f32 VMEM scratch.
    acc_ref[...] += jnp.dot(z.astype(jnp.bfloat16), w2_ref[...],
                            preferred_element_type=jnp.float32)

    # Epilogue on the last FFN chunk: bias + residual + TF-style LayerNorm.
    # TODO(synk): dropout before the residual is identity here (eval/inference);
    # train-mode dropout would need pltpu.prng_* masking.
    @pl.when(k == pl.num_programs(1) - 1)
    def _():
        h = acc_ref[...] + b2_ref[...] + x                     # pad cols of h are 0
        inv_h = 1.0 / float(true_h)
        u = jnp.sum(h, axis=-1, keepdims=True) * inv_h
        d = h - u
        if padded_h != true_h:
            lane = jax.lax.broadcasted_iota(jnp.int32, d.shape, 1)
            d = jnp.where(lane < true_h, d, 0.0)               # mask pad lanes
        s = jnp.sum(d * d, axis=-1, keepdims=True) * inv_h
        out = lnw_ref[...] * (d * jax.lax.rsqrt(s + _EPS)) + lnb_ref[...]
        o_ref[...] = out.astype(o_ref.dtype)


def _round_up(a, b):
    return (a + b - 1) // b * b


def _vmem_budget():
    """Generation-aware VMEM working-set budget + explicit scoped-VMEM limit."""
    cap = None
    try:
        cap = getattr(pltpu.get_tpu_info(), "vmem_capacity_bytes", None)
    except Exception:
        cap = None
    if not cap:
        cap = 64 * 1024 * 1024                   # conservative: v7x per-core VMEM
    budget = int(cap * 0.72)                     # ~46 MiB on v7x, ~92 MiB on v5e/v6e
    limit = int(min(cap - (2 << 20), budget + (8 << 20)))
    return budget, limit


def _pick_tiles(m_rows, hp, ff, budget_bytes):
    """Choose (bm, tff, nff): row block (multiple of 8, capped at 512) and FFN
    chunk (multiple of 256 dividing 4H exactly) fitting the VMEM budget."""
    bm_cap = min(512, _round_up(max(m_rows, 8), 8))
    if ff % 256 == 0 and ff > 512:
        tff_cands = [t for t in range(min(ff, 2048), 255, -256) if ff % t == 0]
    else:
        tff_cands = [ff]

    def est(bm, tff):
        io = 2 * 2 * bm * hp * 4             # x + out blocks, double buffered
        acc = bm * hp * 4                    # f32 accumulator scratch
        inter = 3 * bm * tff * 4             # z (f32) + gelu temp + bf16 copy
        wts = 2 * (2 * hp * tff) * 2         # bf16 w1 + w2 chunks, double buffered
        small = 4 * (tff + 3 * hp) * 4       # biases / LN vectors
        return io + acc + inter + wts + small

    best = None
    for tff in tff_cands:
        bm = bm_cap
        while bm > 8 and est(bm, tff) > budget_bytes:
            bm -= 8
        if est(bm, tff) > budget_bytes and tff != tff_cands[-1]:
            continue                         # even bm=8 does not fit: shrink tff
        if best is None or bm > best[0]:
            best = (bm, tff)
        if bm >= min(bm_cap, 256):
            break                            # largest tff with a healthy row block
    bm, tff = best
    return bm, tff, ff // tff


def intermediate_forward(x, params):
    """Pallas forward of `Intermediate` for x of shape (batch, seq, hidden)."""
    B, N, H = x.shape
    M = B * N
    FF = 4 * H
    Hp = H if H % 128 == 0 else _round_up(H, 128)
    pad_c = Hp - H

    budget, vmem_limit = _vmem_budget()
    bm, tff, nff = _pick_tiles(M, Hp, FF, budget)
    grid = (pl.cdiv(M, bm), nff)

    # Flatten batch*seq into rows; lane-pad hidden to Hp with zero columns only
    # when H is not already a multiple of 128 (no row padding / slicing needed).
    x2 = x.reshape(M, H).astype(jnp.float32)
    if pad_c:
        x2 = jnp.pad(x2, ((0, 0), (0, pad_c)))

    # Weights: bf16 for the MXU; biases / LN params stay f32 for the VPU.
    # Padded hidden columns are zero so dense_2 output / residual pad lanes are 0.
    w1 = jnp.pad(params["w1"], ((0, pad_c), (0, 0))).astype(jnp.bfloat16)
    w2 = jnp.pad(params["w2"], ((0, 0), (0, pad_c))).astype(jnp.bfloat16)
    b1 = params["b1"].reshape(1, FF).astype(jnp.float32)
    b2 = jnp.pad(params["b2"], (0, pad_c)).reshape(1, Hp).astype(jnp.float32)
    lnw = jnp.pad(params["ln_w"], (0, pad_c)).reshape(1, Hp).astype(jnp.float32)
    lnb = jnp.pad(params["ln_b"], (0, pad_c)).reshape(1, Hp).astype(jnp.float32)

    in_specs = [
        pl.BlockSpec((bm, Hp), lambda i, k: (i, 0)),           # x row block
        pl.BlockSpec((Hp, tff), lambda i, k: (0, k)),          # w1 FFN chunk
        pl.BlockSpec((1, tff), lambda i, k: (0, k)),           # b1 FFN chunk
        pl.BlockSpec((tff, Hp), lambda i, k: (k, 0)),          # w2 FFN chunk
        pl.BlockSpec((1, Hp), lambda i, k: (0, 0)),            # b2
        pl.BlockSpec((1, Hp), lambda i, k: (0, 0)),            # ln_w
        pl.BlockSpec((1, Hp), lambda i, k: (0, 0)),            # ln_b
    ]
    out_spec = pl.BlockSpec((bm, Hp), lambda i, k: (i, 0))

    cost = pl.CostEstimate(
        flops=4 * M * FF * H,                                  # two H<->4H matmuls
        transcendentals=M * FF + M,                            # erf per FFN elem + rsqrt
        bytes_accessed=2 * M * Hp * 4 + 2 * Hp * FF * 2 + 8 * Hp,
    )

    out = pl.pallas_call(
        partial(_intermediate_kernel, true_h=H, padded_h=Hp),
        out_shape=jax.ShapeDtypeStruct((M, Hp), jnp.float32),
        grid=grid,
        in_specs=in_specs,
        out_specs=out_spec,
        scratch_shapes=[pltpu.VMEM((bm, Hp), jnp.float32)],
        compiler_params=pltpu.CompilerParams(
            dimension_semantics=("parallel", "arbitrary"),
            vmem_limit_bytes=vmem_limit),
        cost_estimate=cost,
    )(x2, w1, b1, w2, b2, lnw, lnb)

    if pad_c:
        out = out[:, :H]
    return out.reshape(B, N, H).astype(x.dtype)


def init_params(key, hidden):
    """PyTorch nn.Linear-style init for Intermediate."""
    k1, k2, k3, k4 = jax.random.split(key, 4)
    lim1 = 1.0 / math.sqrt(hidden)
    lim2 = 1.0 / math.sqrt(4 * hidden)
    return dict(
        w1=jax.random.uniform(k1, (hidden, 4 * hidden), jnp.float32, -lim1, lim1),
        b1=jax.random.uniform(k2, (4 * hidden,), jnp.float32, -lim1, lim1),
        w2=jax.random.uniform(k3, (4 * hidden, hidden), jnp.float32, -lim2, lim2),
        b2=jax.random.uniform(k4, (hidden,), jnp.float32, -lim2, lim2),
        ln_w=jnp.ones((hidden,), jnp.float32),
        ln_b=jnp.zeros((hidden,), jnp.float32),
    )


def ref_forward(x, params):
    """Pure-JAX f32 reference matching the PyTorch Intermediate.forward."""
    z = jnp.einsum("bnh,hk->bnk", x, params["w1"],
                   precision=jax.lax.Precision.HIGHEST) + params["b1"]
    z = z * 0.5 * (1.0 + jax.lax.erf(z / math.sqrt(2.0)))
    h = jnp.einsum("bnk,kh->bnh", z, params["w2"],
                   precision=jax.lax.Precision.HIGHEST) + params["b2"]
    h = h + x
    u = jnp.mean(h, axis=-1, keepdims=True)
    d = h - u
    s = jnp.mean(d * d, axis=-1, keepdims=True)
    return params["ln_w"] * (d / jnp.sqrt(s + _EPS)) + params["ln_b"]


if __name__ == "__main__":
    B, N, H = 2, 8, 32  # batch, seq_len, hidden_size
    key = jax.random.PRNGKey(0)
    kx, kp = jax.random.split(key)
    x = jax.random.normal(kx, (B, N, H), jnp.float32)
    params = init_params(kp, H)

    out = jax.block_until_ready(intermediate_forward(x, params))

    ref = ref_forward(x, params)
    np.testing.assert_allclose(np.asarray(out), np.asarray(ref), atol=2e-2, rtol=2e-2)
    print("KERNEL_OK")
</pallas_src>

<mosaic_0001>
module attributes {stable_mosaic.version = 11 : i64} {
  func.func @_intermediate_kernel(%arg0: i32, %arg1: i32, %arg2: memref<16x128xf32, #tpu.memory_space<vmem>>, %arg3: memref<128x128xbf16, #tpu.memory_space<vmem>>, %arg4: memref<1x128xf32, #tpu.memory_space<vmem>>, %arg5: memref<128x128xbf16, #tpu.memory_space<vmem>>, %arg6: memref<1x128xf32, #tpu.memory_space<vmem>>, %arg7: memref<1x128xf32, #tpu.memory_space<vmem>>, %arg8: memref<1x128xf32, #tpu.memory_space<vmem>>, %arg9: memref<16x128xf32, #tpu.memory_space<vmem>>, %arg10: memref<16x128xf32, #tpu.memory_space<vmem>>) attributes {dimension_semantics = [#tpu.dimension_semantics<parallel>, #tpu.dimension_semantics<arbitrary>], iteration_bounds = array<i64: 1, 1>, scalar_prefetch = 0 : i64, scratch_operands = 1 : i64, tpu.core_type = #tpu.core_type<tc>, window_params = [{transform_indices = @transform_0, window_bounds = array<i64: 16, 128>}, {transform_indices = @transform_1, window_bounds = array<i64: 128, 128>}, {transform_indices = @transform_2, window_bounds = array<i64: 1, 128>}, {transform_indices = @transform_3, window_bounds = array<i64: 128, 128>}, {pipeline_mode = #tpu.pipeline_mode<synchronous>, transform_indices = @transform_4, window_bounds = array<i64: 1, 128>}, {pipeline_mode = #tpu.pipeline_mode<synchronous>, transform_indices = @transform_5, window_bounds = array<i64: 1, 128>}, {pipeline_mode = #tpu.pipeline_mode<synchronous>, transform_indices = @transform_6, window_bounds = array<i64: 1, 128>}, {transform_indices = @transform_7, window_bounds = array<i64: 16, 128>}]} {
    %c0_i32 = arith.constant 0 : i32
    %0 = arith.cmpi eq, %arg1, %c0_i32 : i32
    %1 = arith.extui %0 : i1 to i32
    %c0_i32_0 = arith.constant 0 : i32
    %2 = arith.cmpi ne, %1, %c0_i32_0 : i32
    scf.if %2 {
      %cst_18 = arith.constant 0.000000e+00 : f32
      %27 = vector.broadcast %cst_18 : f32 to vector<16x128xf32>
      %c0_19 = arith.constant 0 : index
      %c0_20 = arith.constant 0 : index
      %28 = vector.load %arg10[%c0_19, %c0_20] : memref<16x128xf32, #tpu.memory_space<vmem>>, vector<16x128xf32>
      tpu.vector_store %arg10[%c0_19, %c0_20], %27 {strides = array<i32>} : memref<16x128xf32, #tpu.memory_space<vmem>>, vector<16x128xf32>,
    } else {
    }
    %c0 = arith.constant 0 : index
    %c0_1 = arith.constant 0 : index
    %3 = vector.load %arg2[%c0, %c0_1] : memref<16x128xf32, #tpu.memory_space<vmem>>, vector<16x128xf32>
    %4 = arith.truncf %3 : vector<16x128xf32> to vector<16x128xbf16>
    %c0_2 = arith.constant 0 : index
    %c0_3 = arith.constant 0 : index
    %5 = vector.load %arg3[%c0_2, %c0_3] : memref<128x128xbf16, #tpu.memory_space<vmem>>, vector<128x128xbf16>
    %cst = arith.constant dense<0.000000e+00> : vector<16x128xf32>
    %6 = tpu.matmul %4, %5, %cst {dimension_numbers = #tpu.dot_dimension_numbers<[1], [0], [0], [1], [0, 0, 1, 1], [], []>} : vector<16x128xbf16>, vector<128x128xbf16>, vector<16x128xf32> -> vector<16x128xf32>
    %c0_4 = arith.constant 0 : index
    %c0_5 = arith.constant 0 : index
    %7 = vector.load %arg4[%c0_4, %c0_5] : memref<1x128xf32, #tpu.memory_space<vmem>>, vector<1x128xf32>
    %8 = vector.broadcast %7 : vector<1x128xf32> to vector<16x128xf32>
    %9 = arith.addf %6, %8 : vector<16x128xf32>
    %cst_6 = arith.constant 5.000000e-01 : f32
    %10 = vector.broadcast %cst_6 : f32 to vector<16x128xf32>
    %11 = arith.mulf %9, %10 : vector<16x128xf32>
    %cst_7 = arith.constant 0.707106769 : f32
    %12 = vector.broadcast %cst_7 : f32 to vector<16x128xf32>
    %13 = arith.mulf %9, %12 : vector<16x128xf32>
    %14 = math.erf %13 : vector<16x128xf32>
    %cst_8 = arith.constant 1.000000e+00 : f32
    %15 = vector.broadcast %cst_8 : f32 to vector<16x128xf32>
    %16 = arith.addf %15, %14 : vector<16x128xf32>
    %17 = arith.mulf %11, %16 : vector<16x128xf32>
    %c0_9 = arith.constant 0 : index
    %c0_10 = arith.constant 0 : index
    %18 = vector.load %arg10[%c0_9, %c0_10] : memref<16x128xf32, #tpu.memory_space<vmem>>, vector<16x128xf32>
    %19 = arith.truncf %17 : vector<16x128xf32> to vector<16x128xbf16>
    %c0_11 = arith.constant 0 : index
    %c0_12 = arith.constant 0 : index
    %20 = vector.load %arg5[%c0_11, %c0_12] : memref<128x128xbf16, #tpu.memory_space<vmem>>, vector<128x128xbf16>
    %cst_13 = arith.constant dense<0.000000e+00> : vector<16x128xf32>
    %21 = tpu.matmul %19, %20, %cst_13 {dimension_numbers = #tpu.dot_dimension_numbers<[1], [0], [0], [1], [0, 0, 1, 1], [], []>} : vector<16x128xbf16>, vector<128x128xbf16>, vector<16x128xf32> -> vector<16x128xf32>
    %22 = arith.addf %18, %21 : vector<16x128xf32>
    %c0_14 = arith.constant 0 : index
    %c0_15 = arith.constant 0 : index
    %23 = vector.load %arg10[%c0_14, %c0_15] : memref<16x128xf32, #tpu.memory_space<vmem>>, vector<16x128xf32>
    tpu.vector_store %arg10[%c0_14, %c0_15], %22 {strides = array<i32>} : memref<16x128xf32, #tpu.memory_space<vmem>>, vector<16x128xf32>,
    %c0_i32_16 = arith.constant 0 : i32
    %24 = arith.cmpi eq, %arg1, %c0_i32_16 : i32
    %25 = arith.extui %24 : i1 to i32
    %c0_i32_17 = arith.constant 0 : i32
    %26 = arith.cmpi ne, %25, %c0_i32_17 : i32
    scf.if %26 {
      %c0_18 = arith.constant 0 : index
      %c0_19 = arith.constant 0 : index
      %27 = vector.load %arg10[%c0_18, %c0_19] : memref<16x128xf32, #tpu.memory_space<vmem>>, vector<16x128xf32>
      %c0_20 = arith.constant 0 : index
      %c0_21 = arith.constant 0 : index
      %28 = vector.load %arg6[%c0_20, %c0_21] : memref<1x128xf32, #tpu.memory_space<vmem>>, vector<1x128xf32>
      %29 = vector.broadcast %28 : vector<1x128xf32> to vector<16x128xf32>
      %30 = arith.addf %27, %29 : vector<16x128xf32>
      %31 = arith.addf %30, %3 : vector<16x128xf32>
      %cst_22 = arith.constant dense<0.000000e+00> : vector<16xf32>
      %32 = vector.multi_reduction <add>, %31, %cst_22 [1] : vector<16x128xf32> to vector<16xf32>
      %33 = vector.shape_cast %32 : vector<16xf32> to vector<16x1xf32>
      %cst_23 = arith.constant 3.125000e-02 : f32
      %34 = vector.broadcast %cst_23 : f32 to vector<16x1xf32>
      %35 = arith.mulf %33, %34 : vector<16x1xf32>
      %36 = vector.broadcast %35 : vector<16x1xf32> to vector<16x128xf32>
      %37 = arith.subf %31, %36 : vector<16x128xf32>
      %38 = tpu.iota {dimensions = array<i32: 1>} : vector<16x128xi32>
      %c32_i32 = arith.constant 32 : i32
      %39 = vector.broadcast %c32_i32 : i32 to vector<16x128xi32>
      %40 = arith.cmpi slt, %38, %39 : vector<16x128xi32>
      %cst_24 = arith.constant 0.000000e+00 : f32
      %41 = vector.broadcast %cst_24 : f32 to vector<16x128xf32>
      %42 = arith.select %40, %37, %41 : vector<16x128xi1>, vector<16x128xf32>
      %43 = arith.mulf %42, %42 : vector<16x128xf32>
      %cst_25 = arith.constant dense<0.000000e+00> : vector<16xf32>
      %44 = vector.multi_reduction <add>, %43, %cst_25 [1] : vector<16x128xf32> to vector<16xf32>
      %45 = vector.shape_cast %44 : vector<16xf32> to vector<16x1xf32>
      %cst_26 = arith.constant 3.125000e-02 : f32
      %46 = vector.broadcast %cst_26 : f32 to vector<16x1xf32>
      %47 = arith.mulf %45, %46 : vector<16x1xf32>
      %c0_27 = arith.constant 0 : index
      %c0_28 = arith.constant 0 : index
      %48 = vector.load %arg7[%c0_27, %c0_28] : memref<1x128xf32, #tpu.memory_space<vmem>>, vector<1x128xf32>
      %cst_29 = arith.constant 9.99999996E-13 : f32
      %49 = vector.broadcast %cst_29 : f32 to vector<16x1xf32>
      %50 = arith.addf %47, %49 : vector<16x1xf32>
      %51 = math.rsqrt %50 : vector<16x1xf32>
      %52 = vector.broadcast %51 : vector<16x1xf32> to vector<16x128xf32>
      %53 = arith.mulf %42, %52 : vector<16x128xf32>
      %54 = vector.broadcast %48 : vector<1x128xf32> to vector<16x128xf32>
      %55 = arith.mulf %54, %53 : vector<16x128xf32>
      %c0_30 = arith.constant 0 : index
      %c0_31 = arith.constant 0 : index
      %56 = vector.load %arg8[%c0_30, %c0_31] : memref<1x128xf32, #tpu.memory_space<vmem>>, vector<1x128xf32>
      %57 = vector.broadcast %56 : vector<1x128xf32> to vector<16x128xf32>
      %58 = arith.addf %55, %57 : vector<16x128xf32>
      %c0_32 = arith.constant 0 : index
      %c0_33 = arith.constant 0 : index
      %59 = vector.load %arg9[%c0_32, %c0_33] : memref<16x128xf32, #tpu.memory_space<vmem>>, vector<16x128xf32>
      tpu.vector_store %arg9[%c0_32, %c0_33], %58 {strides = array<i32>} : memref<16x128xf32, #tpu.memory_space<vmem>>, vector<16x128xf32>,
    } else {
    }
    return
  }
  func.func @transform_0(%arg0: i32, %arg1: i32) -> (i32, i32) {
    %c0_i32 = arith.constant 0 : i32
    %c0_i32_0 = arith.constant 0 : i32
    return %arg0, %c0_i32 : i32, i32
  }
  func.func @transform_1(%arg0: i32, %arg1: i32) -> (i32, i32) {
    %c0_i32 = arith.constant 0 : i32
    %c0_i32_0 = arith.constant 0 : i32
    return %c0_i32, %arg1 : i32, i32
  }
  func.func @transform_2(%arg0: i32, %arg1: i32) -> (i32, i32) {
    %c0_i32 = arith.constant 0 : i32
    %c0_i32_0 = arith.constant 0 : i32
    return %c0_i32, %arg1 : i32, i32
  }
  func.func @transform_3(%arg0: i32, %arg1: i32) -> (i32, i32) {
    %c0_i32 = arith.constant 0 : i32
    %c0_i32_0 = arith.constant 0 : i32
    return %arg1, %c0_i32 : i32, i32
  }
  func.func @transform_4(%arg0: i32, %arg1: i32) -> (i32, i32) {
    %c0_i32 = arith.constant 0 : i32
    %c0_i32_0 = arith.constant 0 : i32
    %c0_i32_1 = arith.constant 0 : i32
    return %c0_i32, %c0_i32_0 : i32, i32
  }
  func.func @transform_5(%arg0: i32, %arg1: i32) -> (i32, i32) {
    %c0_i32 = arith.constant 0 : i32
    %c0_i32_0 = arith.constant 0 : i32
    %c0_i32_1 = arith.constant 0 : i32
    return %c0_i32, %c0_i32_0 : i32, i32
  }
  func.func @transform_6(%arg0: i32, %arg1: i32) -> (i32, i32) {
    %c0_i32 = arith.constant 0 : i32
    %c0_i32_0 = arith.constant 0 : i32
    %c0_i32_1 = arith.constant 0 : i32
    return %c0_i32, %c0_i32_0 : i32, i32
  }
  func.func @transform_7(%arg0: i32, %arg1: i32) -> (i32, i32) {
    %c0_i32 = arith.constant 0 : i32
    %c0_i32_0 = arith.constant 0 : i32
    return %arg0, %c0_i32 : i32, i32
  }
}

</mosaic_0001>

<bundles_post_ra>
// kernel: tpu_custom_call.1
= control target key start
LH: loop header
LB: loop body
LE: loop exit
PB: predicated region body
PF: predicated region fallthrough
CT: control target
= control target key end

     0   :  { %12 = vsyncpa [#allocation4], 0  ;;  %s671_s0 = inlined_call_operand.hbm [shape: f32[16,128], index: 0, kind: input, shape index: {}]   ;;  %s672_s1 = inlined_call_operand.hbm [shape: bf16[128,128], index: 1, kind: input, shape index: {}]   ;;  %s673_s2 = inlined_call_operand.vmem [shape: f32[1,128], index: 2, kind: input, shape index: {}]   ;;  %s674_s3 = inlined_call_operand.hbm [shape: bf16[128,128], index: 3, kind: input, shape index: {}]   ;;  %s675_s4 = inlined_call_operand.vmem [shape: f32[1,128], index: 4, kind: input, shape index: {}]   ;;  %s676_s5 = inlined_call_operand.vmem [shape: f32[1,128], index: 5, kind: input, shape index: {}]   ;;  %s677_s6 = inlined_call_operand.vmem [shape: f32[1,128], index: 6, kind: input, shape index: {}]   ;;  %s678_s7 = inlined_call_operand.hbm [shape: f32[16,128], index: 7, kind: output, shape index: {}]  }
   0x1   :  { %13 = vsyncpa [#allocation7], 0 }
   0x2   :  { %14 = vsyncpa [#allocation5], 0  ;;  %s591_s24 = smov [#allocation6]  }
   0x3   :  { %s32_s25 = sshll.u32 %s591_s24, 4  ;;  %s33_s25 = int_to_ptr.vmem [resolvable:$true] %s32_s25 }
   0x4   :  { %s513_s26 = scalar_lea.vmem %s33_s25, 1024  ;;  %p518_p1 = scmp.lt.s32.totalorder %s33_s25, %s33_s25 }
   0x5   :  { %p514_p0 = scmp.ne.s32.totalorder %s33_s25, %s513_s26  ;;  %p519_p2 = scmp.lt.s32.totalorder %s513_s26, %s513_s26 }
   0x7   :  { %p520_p3 = por %p519_p2, %p518_p1 }
   0x9   :  { %p521_p4 = pnand %p520_p3, %p514_p0 }
   0xb   :  { %524 = shalt.err (!%p521_p4)
}
   0xc   :  { %s592_s27 = smov 64   ;;  %s593_s28 = smov 4  }
   0xd   :  { %38 = dma.hbm_to_vmem [thread:$0]  %s672_s1, 1024, %s33_s25, [#allocation7], %s592_s27, %s592_s27, %s593_s28  }
   0xe   :  { %s594_s8 = smov [#allocation3]  }
   0xf   :  { %s20_s9 = sshll.u32 %s594_s8, 4  ;;  %s21_s9 = int_to_ptr.vmem [resolvable:$true] %s20_s9 }
  0x10   :  { %s533_s10 = scalar_lea.vmem %s21_s9, 256  ;;  %p538_p6 = scmp.lt.s32.totalorder %s21_s9, %s21_s9 }
  0x11   :  { %p534_p5 = scmp.ne.s32.totalorder %s21_s9, %s533_s10  ;;  %p539_p7 = scmp.lt.s32.totalorder %s533_s10, %s533_s10 }
  0x13   :  { %p540_p8 = por %p539_p7, %p538_p6 }
  0x15   :  { %p541_p9 = pnand %p540_p8, %p534_p5 }
  0x17   :  { %544 = shalt.err (!%p541_p9)
}
  0x18   :  { %s595_s11 = smov 128   ;;  %s596_s12 = smov 8  }
  0x19   :  { %26 = dma.hbm_to_vmem [thread:$0]  %s671_s0, 256, %s21_s9, [#allocation4], %s595_s11, %s595_s11, %s596_s12  }
  0x1a   :  { %s597_s1 = smov [#allocation8]  }
  0x1b   :  { %s46_s15 = sshll.u32 %s597_s1, 4  ;;  %s47_s15 = int_to_ptr.vmem [resolvable:$true] %s46_s15 }
  0x1c   :  { %s553_s16 = scalar_lea.vmem %s47_s15, 1024  ;;  %p558_p11 = scmp.lt.s32.totalorder %s47_s15, %s47_s15 }
  0x1d   :  { %p554_p10 = scmp.ne.s32.totalorder %s47_s15, %s553_s16  ;;  %p559_p12 = scmp.lt.s32.totalorder %s553_s16, %s553_s16 }
  0x1f   :  { %p560_p13 = por %p559_p12, %p558_p11 }
  0x21   :  { %p561_p0 = pnand %p560_p13, %p554_p10 }
  0x23   :  { %564 = shalt.err (!%p561_p0)
}
  0x24   :  { %52 = dma.hbm_to_vmem [thread:$0]  %s674_s3, 1024, %s47_s15, [#allocation7], %s592_s27, %s592_s27, %s593_s28  }
  0x25   :  { %585 = dma.done.wait [#allocation4], 256  }
  0x26   :  { %586 = vsyncadd [#allocation4], 4294967040 }
  0x27   :  { %587 = dma.done.wait [#allocation7], 2048  }
  0x28   :  { %588 = vsyncadd [#allocation7], 4294965248  ;;  %v598_v0 = vmov 0.0   ;;  %vm599_vm0 = vmmov 0   ;;  %v481_v1 = vld [vmem:[#allocation6 + $0x38] sm:$0xff]   ;;  %v482_v2 = vld [vmem:[#allocation6 + $0x30] sm:$0xff]   ;;  %v336_v47 = vlaneseq }
  0x29   :  { %431 = vmatprep.subr.bf16.mxu0 %v598_v0  ;;  %447 = vmatprep.mubr.msk.bf16.mxu0 %vm599_vm0, %v598_v0  ;;  %v483_v3 = vld [vmem:[#allocation6 + $0x28] sm:$0xff]   ;;  %v484_v4 = vld [vmem:[#allocation6 + $0x20] sm:$0xff]   ;;  %v489_v5 = vld [vmem:[#allocation8 + $0x38] sm:$0xff]   ;;  %s600_s23 = smov [#allocation9]  }
  0x2a   :  { %451 = vmatprep.subr.bf16.mxu1 %v598_v0  ;;  %467 = vmatprep.mubr.msk.bf16.mxu1 %vm599_vm0, %v598_v0  ;;  %v485_v6 = vld [vmem:[#allocation6 + $0x18] sm:$0xff]   ;;  %v486_v7 = vld [vmem:[#allocation6 + $0x10] sm:$0xff]   ;;  %v487_v8 = vld [vmem:[#allocation6 + $0x8] sm:$0xff]   ;;  %v337_v48 = vand.u32 127, %v336_v47  ;;  %s380_s24 = sshll.u32 %s600_s23, 4  ;;  %s381_s24 = int_to_ptr.vmem [resolvable:$true] %s380_s24 }
  0x2b   :  { %432 = vmatpush3.bf16.msra.mxu0 %v481_v1  ;;  %452 = vmatpush3.bf16.msra.mxu1 %v489_v5  ;;  %v488_v9 = vld [vmem:[#allocation6] sm:$0xff]   ;;  %v75_v10 = vld [vmem:[#allocation3] sm:$0xff]  ;;  %v76_v11 = vld [vmem:[#allocation3 + $0x8] sm:$0xff]  ;;  %s565_s25 = scalar_lea.vmem %s381_s24, 256  ;;  %p570_p2 = scmp.lt.s32.totalorder %s381_s24, %s381_s24 }
  0x2c   :  { %433 = vmatprep.subr.bf16.mxu0 %v598_v0  ;;  %453 = vmatprep.subr.bf16.mxu1 %v598_v0  ;;  %v77_v12 = vpack.c.bf16 %v76_v11, %v75_v10  ;;  %v490_v13 = vld [vmem:[#allocation8 + $0x30] sm:$0xff]   ;;  %v491_v14 = vld [vmem:[#allocation8 + $0x28] sm:$0xff]   ;;  %v492_v15 = vld [vmem:[#allocation8 + $0x20] sm:$0xff]   ;;  %vm338_vm1 = vcmp.lt.s32.totalorder %v337_v48, 32  ;;  %p566_p1 = scmp.ne.s32.totalorder %s381_s24, %s565_s25  ;;  %p571_p3 = scmp.lt.s32.totalorder %s565_s25, %s565_s25 }
  0x2d   :  { %v493_v16 = vld [vmem:[#allocation8 + $0x18] sm:$0xff]   ;;  %v494_v17 = vld [vmem:[#allocation8 + $0x10] sm:$0xff]   ;;  %v495_v18 = vld [vmem:[#allocation8 + $0x8] sm:$0xff]  }
  0x2e   :  { %v496_v19 = vld [vmem:[#allocation8] sm:$0xff]   ;;  %v393_v20 = vld [vmem:[%s673_s2] ss:$0 sm:$0xff]  ;;  %p572_p4 = por %p571_p3, %p570_p2 }
  0x2f   :  { %434 = vmatpush3.bf16.msra.mxu0 %v482_v2  ;;  %454 = vmatpush3.bf16.msra.mxu1 %v490_v13  ;;  %v410_v38 = vld [vmem:[%s675_s4] ss:$0 sm:$0xff] }
  0x30   :  { %435 = vmatprep.subr.bf16.mxu0 %v598_v0  ;;  %455 = vmatprep.subr.bf16.mxu1 %v598_v0  ;;  %v411_v2 = vld [vmem:[%s676_s5] ss:$0 sm:$0xff]  ;;  %p573_p5 = pnand %p572_p4, %p566_p1 }
  0x33   :  { %436 = vmatpush3.bf16.msra.mxu0 %v483_v3  ;;  %456 = vmatpush3.bf16.msra.mxu1 %v491_v14 }
  0x34   :  { %437 = vmatprep.subr.bf16.mxu0 %v598_v0  ;;  %457 = vmatprep.subr.bf16.mxu1 %v598_v0 }
  0x37   :  { %438 = vmatpush3.bf16.msra.mxu0 %v484_v4  ;;  %458 = vmatpush3.bf16.msra.mxu1 %v492_v15  ;;  %v412_v4 = vld [vmem:[%s677_s6] ss:$0 sm:$0xff] }
  0x38   :  { %439 = vmatprep.subr.bf16.mxu0 %v598_v0  ;;  %459 = vmatprep.subr.bf16.mxu1 %v598_v0 }
  0x3b   :  { %440 = vmatpush3.bf16.msra.mxu0 %v485_v6  ;;  %460 = vmatpush3.bf16.msra.mxu1 %v493_v16 }
  0x3c   :  { %441 = vmatprep.subr.bf16.mxu0 %v598_v0  ;;  %461 = vmatprep.subr.bf16.mxu1 %v598_v0 }
  0x3f   :  { %442 = vmatpush3.bf16.msra.mxu0 %v486_v7  ;;  %462 = vmatpush3.bf16.msra.mxu1 %v494_v17 }
  0x40   :  { %443 = vmatprep.subr.bf16.mxu0 %v598_v0  ;;  %463 = vmatprep.subr.bf16.mxu1 %v598_v0 }
  0x43   :  { %444 = vmatpush3.bf16.msra.mxu0 %v487_v8  ;;  %464 = vmatpush3.bf16.msra.mxu1 %v495_v18 }
  0x44   :  { %445 = vmatprep.subr.bf16.mxu0 %v598_v0  ;;  %465 = vmatprep.subr.bf16.mxu1 %v598_v0 }
  0x47   :  { %446 = vmatpush3.bf16.msra.mxu0 %v488_v9  ;;  %466 = vmatpush3.bf16.msra.mxu1 %v496_v19 }
  0x4a   :  { %448 = vmatmul.mubr.bf16.vlgmr.msra.gmra.mxu0 %v77_v12 }
 0x10a   :  { %v183_v21 = vpop.f32.mrf.mxu0 }
 0x10b   :  { %v184_v22 = vadd.f32 %v393_v20, %v183_v21 }
 0x10c   :  { %v449_v23 = vpop.f32.mrf.mxu0 }
 0x10d   :  { %v192_v24 = vmul.f32 0.70710677, %v184_v22  ;;  %v190_v32 = vmul.f32 0.5, %v184_v22 }
 0x10e   :  { %v186_v25 = vpop.f32.mrf.mxu0 }
 0x10f   :  { %497 = verf.f32 %v192_v24  ;;  %v187_v26 = vadd.f32 %v393_v20, %v186_v25 }
 0x110   :  { %v450_v27 = vpop.f32.mrf.mxu0 }
 0x111   :  { %v193_v28 = vmul.f32 0.70710677, %v187_v26  ;;  %v191_v33 = vmul.f32 0.5, %v187_v26 }
 0x113   :  { %499 = verf.f32 %v193_v28 }
 0x11c   :  { %v498_v29 = vpop.eup %497 }
 0x11d   :  { %v196_v30 = vadd.f32 1.0, %v498_v29 }
 0x11f   :  { %v198_v35 = vmul.f32 %v196_v30, %v190_v32 }
 0x120   :  { %v500_v31 = vpop.eup %499 }
 0x121   :  { %v197_v34 = vadd.f32 1.0, %v500_v31 }
 0x123   :  { %v199_v36 = vmul.f32 %v197_v34, %v191_v33 }
 0x125   :  { %v202_v37 = vpack.c.bf16 %v199_v36, %v198_v35 }
 0x127   :  { %468 = vmatmul.mubr.bf16.vlgmr.msra.gmra.mxu1 %v202_v37 }
 0x1e7   :  { %v301_v39 = vpop.f32.mrf.mxu1 }
 0x1e8   :  { %v324_v40 = vadd.f32 %v410_v38, %v301_v39 }
 0x1e9   :  { %v469_v41 = vpop.f32.mrf.mxu1 }
 0x1ea   :  { %v326_v42 = vadd.f32 %v324_v40, %v75_v10 }
 0x1eb   :  { %v304_v43 = vpop.f32.mrf.mxu1 }
 0x1ec   :  { %v325_v44 = vadd.f32 %v410_v38, %v304_v43  ;;  %328 = vadd.xlane.f32.xlu0 %v326_v42 }
 0x1ed   :  { %v470_v45 = vpop.f32.mrf.mxu1 }
 0x1ee   :  { %v327_v46 = vadd.f32 %v325_v44, %v76_v11 }
 0x1f0   :  { %330 = vadd.xlane.f32.xlu0 %v327_v46 }
 0x275   :  { %v329_v49 = vpop.xlane.xlu0 %328 }
 0x276   :  { %v332_v50 = vmul.f32 0.03125, %v329_v49 }
 0x278   :  { %v334_v51 = vsub.f32 %v326_v42, %v332_v50 }
 0x279   :  { %v331_v52 = vpop.xlane.xlu0 %330 }
 0x27a   :  { %v333_v53 = vmul.f32 0.03125, %v331_v52  ;;  %v339_v54 = vsel %vm338_vm1, %v334_v51, 0.0 }
 0x27b   :  { %v341_v55 = vmul.f32 %v339_v54, %v339_v54 }
 0x27c   :  { %v335_v56 = vsub.f32 %v327_v46, %v333_v53 }
 0x27d   :  { %343 = vadd.xlane.f32.xlu1 %v341_v55 }
 0x27e   :  { %v340_v57 = vsel %vm338_vm1, %v335_v56, 0.0 }
 0x27f   :  { %v342_v58 = vmul.f32 %v340_v57, %v340_v57 }
 0x281   :  { %345 = vadd.xlane.f32.xlu1 %v342_v58 }
 0x306   :  { %v344_v59 = vpop.xlane.xlu1 %343 }
 0x307   :  { %v347_v60 = vmul.f32 0.03125, %v344_v59 }
 0x309   :  { %v350_v61 = vadd.f32 1e-12, %v347_v60 }
 0x30a   :  { %v346_v62 = vpop.xlane.xlu1 %345 }
 0x30b   :  { %501 = vrsqrt.f32 %v350_v61  ;;  %v348_v63 = vmul.f32 0.03125, %v346_v62 }
 0x30d   :  { %v351_v0 = vadd.f32 1e-12, %v348_v63 }
 0x30f   :  { %503 = vrsqrt.f32 %v351_v0 }
 0x318   :  { %v502_v1 = vpop.eup %501 }
 0x319   :  { %v354_v3 = vmul.f32 %v502_v1, %v339_v54 }
 0x31b   :  { %v362_v5 = vmul.f32 %v411_v2, %v354_v3 }
 0x31c   :  { %v504_v6 = vpop.eup %503 }
 0x31d   :  { %v355_v7 = vmul.f32 %v504_v6, %v340_v57  ;;  %v371_v8 = vadd.f32 %v412_v4, %v362_v5 }
 0x31f   :  { %v363_v9 = vmul.f32 %v411_v2, %v355_v7  ;;  %373 = vst [vmem:[#allocation9] sm:$0xff] %v371_v8 }
 0x321   :  { %v372_v10 = vadd.f32 %v412_v4, %v363_v9 }
 0x323   :  { %374 = vst [vmem:[#allocation9 + $0x8] sm:$0xff] %v372_v10 }
 0x324   :  { %576 = shalt.err (!%p573_p5)
}
 0x325   :  { %386 = dma.vmem_to_hbm [thread:$0]  %s381_s24, 256, %s678_s7, [#allocation5], %s595_s11, %s595_s11, %s596_s12  }
 0x326   :  { %589 = dma.done.wait [#allocation5], 256  }
 0x327   :  { %590 = vsyncadd [#allocation5], 4294967040 }
 0x328   :  { %390 = vsyncpa [#allocation4], 1 }
 0x329   :  { %391 = vsyncpa [#allocation7], 1 }
 0x32a   :  { %392 = vsyncpa [#allocation5], 1 }

</bundles_post_ra>
